<compile_context>
chip_gen: v7x
topology: tpu7x:2x2x1
jax: 0.10.0
libtpu: 0.0.40
codegen_flags: <defaults>
</compile_context>

<pallas_src>
import functools

import jax
import jax.numpy as jnp
from jax import lax
from jax.experimental import pallas as pl
from jax.experimental.pallas import tpu as pltpu

_LANES = 128


def _round_up(x, m):
    return ((x + m - 1) // m) * m


def _postprocess_kernel(tgt_ref, logits_ref, bbox_ref,
                        scores_ref, labels_ref, boxes_ref,
                        prob_ref, *, num_select, num_classes):
    b = pl.program_id(0)
    Q, C_pad = prob_ref.shape
    S_pad = scores_ref.shape[-1]

    # ---- prologue: sigmoid once; padded class lanes forced below any probability ----
    ll = lax.broadcasted_iota(jnp.int32, (Q, C_pad), 1)
    prob = jnp.where(ll < num_classes,
                     jax.nn.sigmoid(logits_ref[...].astype(jnp.float32)),
                     -1.0)
    prob_ref[...] = prob

    # ---- per-query top-2 candidate cache: (value, lane) x 2 per query -------------
    v1k = jnp.max(prob, axis=1, keepdims=True)                       # (Q, 1)
    sel1 = jnp.where(prob >= v1k, ll, C_pad)
    l1k = jnp.min(sel1, axis=1, keepdims=True)                       # (Q, 1)
    prob2 = jnp.where(ll == l1k, -1.0, prob)
    v2k = jnp.max(prob2, axis=1, keepdims=True)
    sel2 = jnp.where(prob2 >= v2k, ll, C_pad)

    cand_v1 = jnp.max(prob, axis=1)[None, :]                         # (1, Q) f32
    cand_l1 = jnp.min(sel1, axis=1)[None, :].astype(jnp.int32)       # (1, Q) i32
    cand_v2 = jnp.max(prob2, axis=1)[None, :]
    cand_l2 = jnp.min(sel2, axis=1)[None, :].astype(jnp.int32)
    cand_h2 = jnp.ones((1, Q), jnp.int32)                            # cache depth-2 valid?

    row_ids = lax.broadcasted_iota(jnp.int32, (1, Q), 1)
    lane_ids = lax.broadcasted_iota(jnp.int32, (1, C_pad), 1)
    k_ids = lax.broadcasted_iota(jnp.int32, (1, S_pad), 1)

    init = (cand_v1, cand_l1, cand_v2, cand_l2, cand_h2,
            jnp.zeros((1, S_pad), jnp.float32),
            jnp.zeros((1, S_pad), jnp.int32),
            jnp.zeros((1, S_pad), jnp.int32))

    # ---- serial top-num_select selection over the small (1, Q) candidate vectors ----
    def body(k, carry):
        (cv1, cl1, cv2, cl2, ch2, scores_v, labels_v, qsel_v) = carry

        m = jnp.max(cv1)                                             # best remaining prob
        r = jnp.min(jnp.where(cv1 >= m, row_ids, Q))                 # its query (min on ties)
        atrow = row_ids == r
        lane = jnp.sum(jnp.where(atrow, cl1, 0))                     # its class (cached lane)

        slot = k_ids == k
        scores_v = jnp.where(slot, m, scores_v)
        labels_v = jnp.where(slot, lane, labels_v)
        qsel_v = jnp.where(slot, r, qsel_v)

        # knock the consumed entry out of the VMEM prob matrix (off the carried chain)
        prow = prob_ref[pl.ds(r, 1), :]
        prow = jnp.where(lane_ids == lane, -1.0, prow)
        prob_ref[pl.ds(r, 1), :] = prow

        h2 = jnp.sum(jnp.where(atrow, ch2, 0))

        def _promote():                                              # common path: no re-reduce
            nv1 = jnp.sum(jnp.where(atrow, cv2, jnp.float32(0.0)))
            nl1 = jnp.sum(jnp.where(atrow, cl2, 0))
            return nv1, nl1, jnp.float32(-1.0), jnp.int32(0), jnp.int32(0)

        def _refresh():                                              # rare path: cache exhausted
            nv1 = jnp.max(prow)
            nl1 = jnp.min(jnp.where(prow >= nv1, lane_ids, C_pad))
            prow2 = jnp.where(lane_ids == nl1, -1.0, prow)
            nv2 = jnp.max(prow2)
            nl2 = jnp.min(jnp.where(prow2 >= nv2, lane_ids, C_pad))
            return nv1, nl1, nv2, nl2, jnp.int32(1)

        nv1, nl1, nv2, nl2, nh2 = lax.cond(h2 > 0, _promote, _refresh)

        cv1 = jnp.where(atrow, nv1, cv1)
        cl1 = jnp.where(atrow, nl1, cl1)
        cv2 = jnp.where(atrow, nv2, cv2)
        cl2 = jnp.where(atrow, nl2, cl2)
        ch2 = jnp.where(atrow, nh2, ch2)

        return (cv1, cl1, cv2, cl2, ch2, scores_v, labels_v, qsel_v)

    carry = lax.fori_loop(0, num_select, body, init)
    scores_v, labels_v, qsel_v = carry[5], carry[6], carry[7]

    # ---- cxcywh -> xyxy, lane-dense over Q (padded to 8 sublanes for the MXU) -------
    bb = bbox_ref[...].astype(jnp.float32)                           # (4, Q)
    cx = bb[0:1, :]
    cy = bb[1:2, :]
    w = bb[2:3, :]
    h = bb[3:4, :]
    zero = jnp.zeros_like(cx)
    xyxy = jnp.concatenate([cx - 0.5 * w, cy - 0.5 * h,
                            cx + 0.5 * w, cy + 0.5 * h,
                            zero, zero, zero, zero], axis=0)         # (8, Q)

    # ---- exact one-hot gather of the selected queries (lane-dense MXU output) -------
    q_ids = lax.broadcasted_iota(jnp.int32, (Q, S_pad), 0)
    onehot = (q_ids == qsel_v).astype(jnp.float32)                   # (Q, S_pad)
    hi = xyxy.astype(jnp.bfloat16).astype(jnp.float32)               # bf16-exact part
    lo = xyxy - hi                                                   # residual
    gathered = (jnp.dot(hi, onehot, preferred_element_type=jnp.float32) +
                jnp.dot(lo, onehot, preferred_element_type=jnp.float32))   # (8, S_pad)
    boxes_sel = gathered[0:4, :]                                     # (4, S_pad)

    # ---- scale_fct = [img_w, img_h, img_w, img_h] ------------------------------------
    img_h = tgt_ref[2 * b].astype(jnp.float32)
    img_w = tgt_ref[2 * b + 1].astype(jnp.float32)
    sub4 = lax.broadcasted_iota(jnp.int32, (4, S_pad), 0)
    scale = jnp.where(sub4 % 2 == 0, img_w, img_h)

    scores_ref[...] = scores_v
    labels_ref[...] = labels_v
    boxes_ref[...] = boxes_sel * scale


def post_process(pred_logits, pred_boxes, target_sizes, num_select=100):
    """JAX equivalent of PostProcess.forward (default path: no NMS, no masks)."""
    B, Q, C = pred_logits.shape
    assert target_sizes.shape == (B, 2)
    assert num_select <= Q * C, "num_select must not exceed Q*C"

    C_pad = _round_up(C, _LANES)
    S_pad = _round_up(num_select, _LANES)

    logits = pred_logits.astype(jnp.float32)
    if C_pad != C:
        logits = jnp.pad(logits, ((0, 0), (0, 0), (0, C_pad - C)),
                         constant_values=-1e9)                       # lane pad only
    boxes_t = jnp.transpose(pred_boxes.astype(jnp.float32), (0, 2, 1))   # (B, 4, Q)
    tgt = target_sizes.astype(jnp.int32).reshape(-1)                 # (2*B,) for SMEM

    kernel = functools.partial(_postprocess_kernel,
                               num_select=num_select, num_classes=C)

    scores, labels, boxes = pl.pallas_call(
        kernel,
        out_shape=(
            jax.ShapeDtypeStruct((B, 1, S_pad), jnp.float32),
            jax.ShapeDtypeStruct((B, 1, S_pad), jnp.int32),
            jax.ShapeDtypeStruct((B, 4, S_pad), jnp.float32),
        ),
        grid_spec=pltpu.PrefetchScalarGridSpec(
            num_scalar_prefetch=1,                                   # target_sizes in SMEM
            grid=(B,),
            in_specs=[
                pl.BlockSpec((None, Q, C_pad), lambda b, s: (b, 0, 0)),
                pl.BlockSpec((None, 4, Q), lambda b, s: (b, 0, 0)),
            ],
            out_specs=(
                pl.BlockSpec((None, 1, S_pad), lambda b, s: (b, 0, 0)),
                pl.BlockSpec((None, 1, S_pad), lambda b, s: (b, 0, 0)),
                pl.BlockSpec((None, 4, S_pad), lambda b, s: (b, 0, 0)),
            ),
            scratch_shapes=[pltpu.VMEM((Q, C_pad), jnp.float32)],
        ),
        compiler_params=pltpu.CompilerParams(
            dimension_semantics=("parallel",)),                      # batch elems independent
    )(tgt, logits, boxes_t)

    scores = scores[:, 0, :num_select]
    labels = labels[:, 0, :num_select]
    boxes = jnp.transpose(boxes, (0, 2, 1))[:, :num_select, :]
    return scores, labels, boxes


def _reference(pred_logits, pred_boxes, target_sizes, num_select):
    """Pure-JAX reference mirroring the PyTorch forward (default path)."""
    B, Q, C = pred_logits.shape
    prob = jax.nn.sigmoid(pred_logits.astype(jnp.float32)).reshape(B, -1)
    scores, idx = lax.top_k(prob, num_select)
    topk_q = idx // C
    labels = idx % C
    cx, cy, w, h = jnp.split(pred_boxes.astype(jnp.float32), 4, axis=-1)
    xyxy = jnp.concatenate([cx - 0.5 * w, cy - 0.5 * h,
                            cx + 0.5 * w, cy + 0.5 * h], axis=-1)
    boxes = jnp.take_along_axis(xyxy, topk_q[..., None], axis=1)
    img_h = target_sizes[:, 0].astype(jnp.float32)
    img_w = target_sizes[:, 1].astype(jnp.float32)
    scale = jnp.stack([img_w, img_h, img_w, img_h], axis=1)
    return scores, labels, boxes * scale[:, None, :]


# TODO(synk): use_opt / nms_iou_threshold>0 branches (batched_nms with variable-length
# keep lists), the optional 'pred_masks' gather, and the `test=True` box re-encoding
# are not implemented (data-dependent / optional paths outside the default forward).

if __name__ == "__main__":
    B, Q, C = 2, 12, 20
    NUM_SELECT = 40          # > Q on purpose: exercises the top-2 cache refresh path

    key = jax.random.PRNGKey(0)
    k1, k2 = jax.random.split(key)
    pred_logits = jax.random.normal(k1, (B, Q, C), dtype=jnp.float32)
    pred_boxes = jax.random.uniform(k2, (B, Q, 4), dtype=jnp.float32,
                                    minval=0.05, maxval=0.95)
    target_sizes = jnp.array([[480, 640], [320, 512]], dtype=jnp.int32)

    scores, labels, boxes = post_process(pred_logits, pred_boxes,
                                         target_sizes, num_select=NUM_SELECT)
    jax.block_until_ready((scores, labels, boxes))

    ref_scores, ref_labels, ref_boxes = _reference(pred_logits, pred_boxes,
                                                   target_sizes, NUM_SELECT)

    assert scores.shape == (B, NUM_SELECT) and boxes.shape == (B, NUM_SELECT, 4)
    assert jnp.allclose(scores, ref_scores, atol=1e-5), "scores mismatch"
    assert jnp.array_equal(labels, ref_labels), "labels mismatch"
    assert jnp.allclose(boxes, ref_boxes, atol=1e-2), "boxes mismatch"

    print("KERNEL_OK")
</pallas_src>

<mosaic_0001>
module attributes {stable_mosaic.version = 11 : i64} {
  func.func @_postprocess_kernel(%arg0: i32, %arg1: memref<4xi32, #tpu.memory_space<smem>>, %arg2: memref<1x12x128xf32, #tpu.memory_space<vmem>>, %arg3: memref<1x4x12xf32, #tpu.memory_space<vmem>>, %arg4: memref<1x1x128xf32, #tpu.memory_space<vmem>>, %arg5: memref<1x1x128xi32, #tpu.memory_space<vmem>>, %arg6: memref<1x4x128xf32, #tpu.memory_space<vmem>>, %arg7: memref<12x128xf32, #tpu.memory_space<vmem>>) attributes {dimension_semantics = [#tpu.dimension_semantics<parallel>], iteration_bounds = array<i64: 2>, scalar_prefetch = 1 : i64, scratch_operands = 1 : i64, tpu.core_type = #tpu.core_type<tc>, window_params = [{transform_indices = @transform_0, window_bounds = array<i64: 1, 12, 128>}, {transform_indices = @transform_1, window_bounds = array<i64: 1, 4, 12>}, {transform_indices = @transform_2, window_bounds = array<i64: 1, 1, 128>}, {transform_indices = @transform_3, window_bounds = array<i64: 1, 1, 128>}, {transform_indices = @transform_4, window_bounds = array<i64: 1, 4, 128>}]} {
    %0 = tpu.iota {dimensions = array<i32: 1>} : vector<12x128xi32>
    %c20_i32 = arith.constant 20 : i32
    %1 = vector.broadcast %c20_i32 : i32 to vector<12x128xi32>
    %2 = arith.cmpi slt, %0, %1 : vector<12x128xi32>
    %c0 = arith.constant 0 : index
    %c0_0 = arith.constant 0 : index
    %c0_1 = arith.constant 0 : index
    %3 = vector.load %arg2[%c0, %c0_0, %c0_1] : memref<1x12x128xf32, #tpu.memory_space<vmem>>, vector<1x12x128xf32>
    %4 = vector.shape_cast %3 : vector<1x12x128xf32> to vector<12x128xf32>
    %5 = arith.negf %4 : vector<12x128xf32>
    %6 = math.exp %5 : vector<12x128xf32>
    %cst = arith.constant 1.000000e+00 : f32
    %7 = vector.broadcast %cst : f32 to vector<12x128xf32>
    %8 = arith.addf %7, %6 : vector<12x128xf32>
    %9 = arith.divf %7, %8 : vector<12x128xf32>
    %cst_2 = arith.constant -1.000000e+00 : f32
    %10 = vector.broadcast %cst_2 : f32 to vector<12x128xf32>
    %11 = arith.select %2, %9, %10 : vector<12x128xi1>, vector<12x128xf32>
    %c0_3 = arith.constant 0 : index
    %c0_4 = arith.constant 0 : index
    %12 = vector.load %arg7[%c0_3, %c0_4] : memref<12x128xf32, #tpu.memory_space<vmem>>, vector<12x128xf32>
    tpu.vector_store %arg7[%c0_3, %c0_4], %11 {strides = array<i32>} : memref<12x128xf32, #tpu.memory_space<vmem>>, vector<12x128xf32>,
    %cst_5 = arith.constant dense<0xFF800000> : vector<12xf32>
    %13 = vector.multi_reduction <maximumf>, %11, %cst_5 [1] : vector<12x128xf32> to vector<12xf32>
    %14 = vector.shape_cast %13 : vector<12xf32> to vector<12x1xf32>
    %15 = vector.broadcast %14 : vector<12x1xf32> to vector<12x128xf32>
    %16 = arith.cmpf oge, %11, %15 : vector<12x128xf32>
    %c128_i32 = arith.constant 128 : i32
    %17 = vector.broadcast %c128_i32 : i32 to vector<12x128xi32>
    %18 = arith.select %16, %0, %17 : vector<12x128xi1>, vector<12x128xi32>
    %cst_6 = arith.constant dense<2147483647> : vector<12xi32>
    %19 = vector.multi_reduction <minsi>, %18, %cst_6 [1] : vector<12x128xi32> to vector<12xi32>
    %20 = vector.shape_cast %19 : vector<12xi32> to vector<12x1xi32>
    %21 = vector.broadcast %20 : vector<12x1xi32> to vector<12x128xi32>
    %22 = arith.cmpi eq, %0, %21 : vector<12x128xi32>
    %cst_7 = arith.constant -1.000000e+00 : f32
    %23 = vector.broadcast %cst_7 : f32 to vector<12x128xf32>
    %24 = arith.select %22, %23, %11 : vector<12x128xi1>, vector<12x128xf32>
    %cst_8 = arith.constant dense<0xFF800000> : vector<12xf32>
    %25 = vector.multi_reduction <maximumf>, %24, %cst_8 [1] : vector<12x128xf32> to vector<12xf32>
    %26 = vector.shape_cast %25 : vector<12xf32> to vector<12x1xf32>
    %27 = vector.broadcast %26 : vector<12x1xf32> to vector<12x128xf32>
    %28 = arith.cmpf oge, %24, %27 : vector<12x128xf32>
    %c128_i32_9 = arith.constant 128 : i32
    %29 = vector.broadcast %c128_i32_9 : i32 to vector<12x128xi32>
    %30 = arith.select %28, %0, %29 : vector<12x128xi1>, vector<12x128xi32>
    %cst_10 = arith.constant dense<0xFF800000> : vector<12xf32>
    %31 = vector.multi_reduction <maximumf>, %11, %cst_10 [1] : vector<12x128xf32> to vector<12xf32>
    %32 = vector.shape_cast %31 : vector<12xf32> to vector<1x12xf32>
    %cst_11 = arith.constant dense<2147483647> : vector<12xi32>
    %33 = vector.multi_reduction <minsi>, %18, %cst_11 [1] : vector<12x128xi32> to vector<12xi32>
    %34 = vector.shape_cast %33 : vector<12xi32> to vector<1x12xi32>
    %cst_12 = arith.constant dense<0xFF800000> : vector<12xf32>
    %35 = vector.multi_reduction <maximumf>, %24, %cst_12 [1] : vector<12x128xf32> to vector<12xf32>
    %36 = vector.shape_cast %35 : vector<12xf32> to vector<1x12xf32>
    %cst_13 = arith.constant dense<2147483647> : vector<12xi32>
    %37 = vector.multi_reduction <minsi>, %30, %cst_13 [1] : vector<12x128xi32> to vector<12xi32>
    %38 = vector.shape_cast %37 : vector<12xi32> to vector<1x12xi32>
    %c1_i32 = arith.constant 1 : i32
    %39 = vector.broadcast %c1_i32 : i32 to vector<1x12xi32>
    %40 = tpu.iota {dimensions = array<i32: 1>} : vector<1x12xi32>
    %41 = tpu.iota {dimensions = array<i32: 1>} : vector<1x128xi32>
    %42 = tpu.iota {dimensions = array<i32: 1>} : vector<1x128xi32>
    %cst_14 = arith.constant 0.000000e+00 : f32
    %43 = vector.broadcast %cst_14 : f32 to vector<1x128xf32>
    %c0_i32 = arith.constant 0 : i32
    %44 = vector.broadcast %c0_i32 : i32 to vector<1x128xi32>
    %c0_i32_15 = arith.constant 0 : i32
    %45 = vector.broadcast %c0_i32_15 : i32 to vector<1x128xi32>
    %c0_i32_16 = arith.constant 0 : i32
    %c40_i32 = arith.constant 40 : i32
    %46 = arith.addi %c0_i32_16, %c40_i32 : i32
    %c1_i32_17 = arith.constant 1 : i32
    %47:8 = scf.for %arg8 = %c0_i32_16 to %46 step %c1_i32_17 iter_args(%arg9 = %32, %arg10 = %34, %arg11 = %36, %arg12 = %38, %arg13 = %39, %arg14 = %43, %arg15 = %44, %arg16 = %45) -> (vector<1x12xf32>, vector<1x12xi32>, vector<1x12xf32>, vector<1x12xi32>, vector<1x12xi32>, vector<1x128xf32>, vector<1x128xi32>, vector<1x128xi32>)  : i32 {
      %121 = vector.shape_cast %arg9 : vector<1x12xf32> to vector<1x1x12xf32>
      %cst_47 = arith.constant dense<0xFF800000> : vector<1xf32>
      %122 = vector.multi_reduction <maximumf>, %121, %cst_47 [1, 2] : vector<1x1x12xf32> to vector<1xf32>
      %123 = vector.shape_cast %122 : vector<1xf32> to vector<1x1x1xf32>
      %124 = vector.extract %123[0, 0, 0] : f32 from vector<1x1x1xf32>
      %125 = vector.broadcast %124 : f32 to vector<1x12xf32>
      %126 = arith.cmpf oge, %arg9, %125 : vector<1x12xf32>
      %c12_i32 = arith.constant 12 : i32
      %127 = vector.broadcast %c12_i32 : i32 to vector<1x12xi32>
      %128 = arith.select %126, %40, %127 : vector<1x12xi1>, vector<1x12xi32>
      %129 = vector.shape_cast %128 : vector<1x12xi32> to vector<1x1x12xi32>
      %cst_48 = arith.constant dense<2147483647> : vector<1xi32>
      %130 = vector.multi_reduction <minsi>, %129, %cst_48 [1, 2] : vector<1x1x12xi32> to vector<1xi32>
      %131 = vector.shape_cast %130 : vector<1xi32> to vector<1x1x1xi32>
      %132 = vector.extract %131[0, 0, 0] : i32 from vector<1x1x1xi32>
      %133 = vector.broadcast %132 : i32 to vector<1x12xi32>
      %134 = arith.cmpi eq, %40, %133 : vector<1x12xi32>
      %c0_i32_49 = arith.constant 0 : i32
      %135 = vector.broadcast %c0_i32_49 : i32 to vector<1x12xi32>
      %136 = arith.select %134, %arg10, %135 : vector<1x12xi1>, vector<1x12xi32>
      %137 = vector.shape_cast %136 : vector<1x12xi32> to vector<1x1x12xi32>
      %cst_50 = arith.constant dense<0> : vector<1xi32>
      %138 = vector.multi_reduction <add>, %137, %cst_50 [1, 2] : vector<1x1x12xi32> to vector<1xi32>
      %139 = vector.shape_cast %138 : vector<1xi32> to vector<1x1x1xi32>
      %140 = vector.extract %139[0, 0, 0] : i32 from vector<1x1x1xi32>
      %141 = vector.broadcast %arg8 : i32 to vector<1x128xi32>
      %142 = arith.cmpi eq, %42, %141 : vector<1x128xi32>
      %143 = vector.broadcast %124 : f32 to vector<1x128xf32>
      %144 = arith.select %142, %143, %arg14 : vector<1x128xi1>, vector<1x128xf32>
      %145 = vector.broadcast %140 : i32 to vector<1x128xi32>
      %146 = arith.select %142, %145, %arg15 : vector<1x128xi1>, vector<1x128xi32>
      %147 = vector.broadcast %132 : i32 to vector<1x128xi32>
      %148 = arith.select %142, %147, %arg16 : vector<1x128xi1>, vector<1x128xi32>
      %149 = arith.index_cast %132 : i32 to index
      %c0_51 = arith.constant 0 : index
      %150 = vector.load %arg7[%149, %c0_51] : memref<12x128xf32, #tpu.memory_space<vmem>>, vector<1x128xf32>
      %151 = vector.broadcast %140 : i32 to vector<1x128xi32>
      %152 = arith.cmpi eq, %41, %151 : vector<1x128xi32>
      %cst_52 = arith.constant -1.000000e+00 : f32
      %153 = vector.broadcast %cst_52 : f32 to vector<1x128xf32>
      %154 = arith.select %152, %153, %150 : vector<1x128xi1>, vector<1x128xf32>
      %155 = arith.index_cast %132 : i32 to index
      %c0_53 = arith.constant 0 : index
      %156 = vector.load %arg7[%155, %c0_53] : memref<12x128xf32, #tpu.memory_space<vmem>>, vector<1x128xf32>
      tpu.vector_store %arg7[%155, %c0_53], %154 {strides = array<i32>} : memref<12x128xf32, #tpu.memory_space<vmem>>, vector<1x128xf32>,
      %c0_i32_54 = arith.constant 0 : i32
      %157 = vector.broadcast %c0_i32_54 : i32 to vector<1x12xi32>
      %158 = arith.select %134, %arg13, %157 : vector<1x12xi1>, vector<1x12xi32>
      %159 = vector.shape_cast %158 : vector<1x12xi32> to vector<1x1x12xi32>
      %cst_55 = arith.constant dense<0> : vector<1xi32>
      %160 = vector.multi_reduction <add>, %159, %cst_55 [1, 2] : vector<1x1x12xi32> to vector<1xi32>
      %161 = vector.shape_cast %160 : vector<1xi32> to vector<1x1x1xi32>
      %162 = vector.extract %161[0, 0, 0] : i32 from vector<1x1x1xi32>
      %c0_i32_56 = arith.constant 0 : i32
      %163 = arith.cmpi sgt, %162, %c0_i32_56 : i32
      %164 = arith.extui %163 : i1 to i32
      %c0_i32_57 = arith.constant 0 : i32
      %165 = arith.cmpi ne, %164, %c0_i32_57 : i32
      %166:5 = scf.if %165 -> (f32, i32, f32, i32, i32) {
        %cst_58 = arith.constant 0.000000e+00 : f32
        %177 = vector.broadcast %cst_58 : f32 to vector<1x12xf32>
        %178 = arith.select %134, %arg11, %177 : vector<1x12xi1>, vector<1x12xf32>
        %179 = vector.shape_cast %178 : vector<1x12xf32> to vector<1x1x12xf32>
        %cst_59 = arith.constant dense<0.000000e+00> : vector<1xf32>
        %180 = vector.multi_reduction <add>, %179, %cst_59 [1, 2] : vector<1x1x12xf32> to vector<1xf32>
        %181 = vector.shape_cast %180 : vector<1xf32> to vector<1x1x1xf32>
        %182 = vector.extract %181[0, 0, 0] : f32 from vector<1x1x1xf32>
        %c0_i32_60 = arith.constant 0 : i32
        %183 = vector.broadcast %c0_i32_60 : i32 to vector<1x12xi32>
        %184 = arith.select %134, %arg12, %183 : vector<1x12xi1>, vector<1x12xi32>
        %185 = vector.shape_cast %184 : vector<1x12xi32> to vector<1x1x12xi32>
        %cst_61 = arith.constant dense<0> : vector<1xi32>
        %186 = vector.multi_reduction <add>, %185, %cst_61 [1, 2] : vector<1x1x12xi32> to vector<1xi32>
        %187 = vector.shape_cast %186 : vector<1xi32> to vector<1x1x1xi32>
        %188 = vector.extract %187[0, 0, 0] : i32 from vector<1x1x1xi32>
        %cst_62 = arith.constant -1.000000e+00 : f32
        %c0_i32_63 = arith.constant 0 : i32
        %c0_i32_64 = arith.constant 0 : i32
        scf.yield %182, %188, %cst_62, %c0_i32_63, %c0_i32_64 : f32, i32, f32, i32, i32
      } else {
        %177 = vector.shape_cast %154 : vector<1x128xf32> to vector<1x1x128xf32>
        %cst_58 = arith.constant dense<0xFF800000> : vector<1xf32>
        %178 = vector.multi_reduction <maximumf>, %177, %cst_58 [1, 2] : vector<1x1x128xf32> to vector<1xf32>
        %179 = vector.shape_cast %178 : vector<1xf32> to vector<1x1x1xf32>
        %180 = vector.extract %179[0, 0, 0] : f32 from vector<1x1x1xf32>
        %181 = vector.broadcast %180 : f32 to vector<1x128xf32>
        %182 = arith.cmpf oge, %154, %181 : vector<1x128xf32>
        %c128_i32_59 = arith.constant 128 : i32
        %183 = vector.broadcast %c128_i32_59 : i32 to vector<1x128xi32>
        %184 = arith.select %182, %41, %183 : vector<1x128xi1>, vector<1x128xi32>
        %185 = vector.shape_cast %184 : vector<1x128xi32> to vector<1x1x128xi32>
        %cst_60 = arith.constant dense<2147483647> : vector<1xi32>
        %186 = vector.multi_reduction <minsi>, %185, %cst_60 [1, 2] : vector<1x1x128xi32> to vector<1xi32>
        %187 = vector.shape_cast %186 : vector<1xi32> to vector<1x1x1xi32>
        %188 = vector.extract %187[0, 0, 0] : i32 from vector<1x1x1xi32>
        %189 = vector.broadcast %188 : i32 to vector<1x128xi32>
        %190 = arith.cmpi eq, %41, %189 : vector<1x128xi32>
        %cst_61 = arith.constant -1.000000e+00 : f32
        %191 = vector.broadcast %cst_61 : f32 to vector<1x128xf32>
        %192 = arith.select %190, %191, %154 : vector<1x128xi1>, vector<1x128xf32>
        %193 = vector.shape_cast %192 : vector<1x128xf32> to vector<1x1x128xf32>
        %cst_62 = arith.constant dense<0xFF800000> : vector<1xf32>
        %194 = vector.multi_reduction <maximumf>, %193, %cst_62 [1, 2] : vector<1x1x128xf32> to vector<1xf32>
        %195 = vector.shape_cast %194 : vector<1xf32> to vector<1x1x1xf32>
        %196 = vector.extract %195[0, 0, 0] : f32 from vector<1x1x1xf32>
        %197 = vector.broadcast %196 : f32 to vector<1x128xf32>
        %198 = arith.cmpf oge, %192, %197 : vector<1x128xf32>
        %c128_i32_63 = arith.constant 128 : i32
        %199 = vector.broadcast %c128_i32_63 : i32 to vector<1x128xi32>
        %200 = arith.select %198, %41, %199 : vector<1x128xi1>, vector<1x128xi32>
        %201 = vector.shape_cast %200 : vector<1x128xi32> to vector<1x1x128xi32>
        %cst_64 = arith.constant dense<2147483647> : vector<1xi32>
        %202 = vector.multi_reduction <minsi>, %201, %cst_64 [1, 2] : vector<1x1x128xi32> to vector<1xi32>
        %203 = vector.shape_cast %202 : vector<1xi32> to vector<1x1x1xi32>
        %204 = vector.extract %203[0, 0, 0] : i32 from vector<1x1x1xi32>
        %c1_i32_65 = arith.constant 1 : i32
        scf.yield %180, %188, %196, %204, %c1_i32_65 : f32, i32, f32, i32, i32
      }
      %167 = vector.broadcast %166#0 : f32 to vector<1x12xf32>
      %168 = arith.select %134, %167, %arg9 : vector<1x12xi1>, vector<1x12xf32>
      %169 = vector.broadcast %166#1 : i32 to vector<1x12xi32>
      %170 = arith.select %134, %169, %arg10 : vector<1x12xi1>, vector<1x12xi32>
      %171 = vector.broadcast %166#2 : f32 to vector<1x12xf32>
      %172 = arith.select %134, %171, %arg11 : vector<1x12xi1>, vector<1x12xf32>
      %173 = vector.broadcast %166#3 : i32 to vector<1x12xi32>
      %174 = arith.select %134, %173, %arg12 : vector<1x12xi1>, vector<1x12xi32>
      %175 = vector.broadcast %166#4 : i32 to vector<1x12xi32>
      %176 = arith.select %134, %175, %arg13 : vector<1x12xi1>, vector<1x12xi32>
      scf.yield %168, %170, %172, %174, %176, %144, %146, %148 : vector<1x12xf32>, vector<1x12xi32>, vector<1x12xf32>, vector<1x12xi32>, vector<1x12xi32>, vector<1x128xf32>, vector<1x128xi32>, vector<1x128xi32>
    }
    %c40_i32_18 = arith.constant 40 : i32
    %c0_19 = arith.constant 0 : index
    %c0_20 = arith.constant 0 : index
    %c0_21 = arith.constant 0 : index
    %48 = vector.load %arg3[%c0_19, %c0_20, %c0_21] : memref<1x4x12xf32, #tpu.memory_space<vmem>>, vector<1x4x12xf32>
    %49 = vector.shape_cast %48 : vector<1x4x12xf32> to vector<4x12xf32>
    %50 = vector.extract_strided_slice %49 {offsets = [0, 0], sizes = [1, 12], strides = [1, 1]} : vector<4x12xf32> to vector<1x12xf32>
    %51 = vector.extract_strided_slice %49 {offsets = [1, 0], sizes = [1, 12], strides = [1, 1]} : vector<4x12xf32> to vector<1x12xf32>
    %52 = vector.extract_strided_slice %49 {offsets = [2, 0], sizes = [1, 12], strides = [1, 1]} : vector<4x12xf32> to vector<1x12xf32>
    %53 = vector.extract_strided_slice %49 {offsets = [3, 0], sizes = [1, 12], strides = [1, 1]} : vector<4x12xf32> to vector<1x12xf32>
    %cst_22 = arith.constant 0.000000e+00 : f32
    %54 = vector.broadcast %cst_22 : f32 to vector<1x12xf32>
    %cst_23 = arith.constant 5.000000e-01 : f32
    %55 = vector.broadcast %cst_23 : f32 to vector<1x12xf32>
    %56 = arith.mulf %55, %52 : vector<1x12xf32>
    %57 = arith.subf %50, %56 : vector<1x12xf32>
    %cst_24 = arith.constant 5.000000e-01 : f32
    %58 = vector.broadcast %cst_24 : f32 to vector<1x12xf32>
    %59 = arith.mulf %58, %53 : vector<1x12xf32>
    %60 = arith.subf %51, %59 : vector<1x12xf32>
    %cst_25 = arith.constant 5.000000e-01 : f32
    %61 = vector.broadcast %cst_25 : f32 to vector<1x12xf32>
    %62 = arith.mulf %61, %52 : vector<1x12xf32>
    %63 = arith.addf %50, %62 : vector<1x12xf32>
    %cst_26 = arith.constant 5.000000e-01 : f32
    %64 = vector.broadcast %cst_26 : f32 to vector<1x12xf32>
    %65 = arith.mulf %64, %53 : vector<1x12xf32>
    %66 = arith.addf %51, %65 : vector<1x12xf32>
    %67 = tpu.concatenate %57, %60, %63, %66, %54, %54, %54, %54 in 0 : vector<1x12xf32>, vector<1x12xf32>, vector<1x12xf32>, vector<1x12xf32>, vector<1x12xf32>, vector<1x12xf32>, vector<1x12xf32>, vector<1x12xf32> -> vector<8x12xf32>
    %68 = tpu.iota {dimensions = array<i32: 0>} : vector<12x128xi32>
    %69 = vector.broadcast %47#7 : vector<1x128xi32> to vector<12x128xi32>
    %70 = arith.cmpi eq, %68, %69 : vector<12x128xi32>
    %71 = arith.extui %70 : vector<12x128xi1> to vector<12x128xi32>
    %72 = arith.sitofp %71 : vector<12x128xi32> to vector<12x128xf32>
    %73 = arith.truncf %67 : vector<8x12xf32> to vector<8x12xbf16>
    %74 = arith.extf %73 : vector<8x12xbf16> to vector<8x12xf32>
    %75 = arith.subf %67, %74 : vector<8x12xf32>
    %cst_27 = arith.constant dense<0.000000e+00> : vector<8x128xf32>
    %76 = tpu.matmul %74, %72, %cst_27 {dimension_numbers = #tpu.dot_dimension_numbers<[1], [0], [0], [1], [0, 0, 1, 1], [], []>} : vector<8x12xf32>, vector<12x128xf32>, vector<8x128xf32> -> vector<8x128xf32>
    %cst_28 = arith.constant dense<0.000000e+00> : vector<8x128xf32>
    %77 = tpu.matmul %75, %72, %cst_28 {dimension_numbers = #tpu.dot_dimension_numbers<[1], [0], [0], [1], [0, 0, 1, 1], [], []>} : vector<8x12xf32>, vector<12x128xf32>, vector<8x128xf32> -> vector<8x128xf32>
    %78 = arith.addf %76, %77 : vector<8x128xf32>
    %79 = vector.extract_strided_slice %78 {offsets = [0, 0], sizes = [4, 128], strides = [1, 1]} : vector<8x128xf32> to vector<4x128xf32>
    %c2_i32 = arith.constant 2 : i32
    %80 = arith.muli %c2_i32, %arg0 : i32
    %81 = arith.index_cast %80 : i32 to index
    %82 = memref.load %arg1[%81] : memref<4xi32, #tpu.memory_space<smem>>
    %83 = arith.sitofp %82 : i32 to f32
    %c2_i32_29 = arith.constant 2 : i32
    %84 = arith.muli %c2_i32_29, %arg0 : i32
    %c1_i32_30 = arith.constant 1 : i32
    %85 = arith.addi %84, %c1_i32_30 : i32
    %86 = arith.index_cast %85 : i32 to index
    %87 = memref.load %arg1[%86] : memref<4xi32, #tpu.memory_space<smem>>
    %88 = arith.sitofp %87 : i32 to f32
    %89 = tpu.iota {dimensions = array<i32: 0>} : vector<4x128xi32>
    %c2_i32_31 = arith.constant 2 : i32
    %c0_i32_32 = arith.constant 0 : i32
    %90 = arith.cmpi eq, %c2_i32_31, %c0_i32_32 : i32
    %c1_i32_33 = arith.constant 1 : i32
    %91 = arith.select %90, %c1_i32_33, %c2_i32_31 : i32
    %92 = vector.broadcast %91 : i32 to vector<4x128xi32>
    %93 = arith.remsi %89, %92 : vector<4x128xi32>
    %c0_i32_34 = arith.constant 0 : i32
    %94 = vector.broadcast %c0_i32_34 : i32 to vector<4x128xi32>
    %95 = arith.cmpi ne, %93, %94 : vector<4x128xi32>
    %c0_i32_35 = arith.constant 0 : i32
    %96 = vector.broadcast %c0_i32_35 : i32 to vector<4x128xi32>
    %97 = arith.cmpi slt, %93, %96 : vector<4x128xi32>
    %c0_i32_36 = arith.constant 0 : i32
    %98 = arith.cmpi slt, %91, %c0_i32_36 : i32
    %99 = vector.broadcast %98 : i1 to vector<4x128xi1>
    %100 = vector.broadcast %99 : vector<4x128xi1> to vector<4x128xi1>
    %101 = arith.xori %97, %100 : vector<4x128xi1>
    %102 = arith.andi %101, %95 : vector<4x128xi1>
    %103 = vector.broadcast %91 : i32 to vector<4x128xi32>
    %104 = arith.addi %93, %103 : vector<4x128xi32>
    %105 = arith.select %102, %104, %93 : vector<4x128xi1>, vector<4x128xi32>
    %c0_i32_37 = arith.constant 0 : i32
    %106 = vector.broadcast %c0_i32_37 : i32 to vector<4x128xi32>
    %107 = arith.cmpi eq, %105, %106 : vector<4x128xi32>
    %108 = vector.broadcast %88 : f32 to vector<4x128xf32>
    %109 = vector.broadcast %83 : f32 to vector<4x128xf32>
    %110 = arith.select %107, %108, %109 : vector<4x128xi1>, vector<4x128xf32>
    %c0_38 = arith.constant 0 : index
    %c0_39 = arith.constant 0 : index
    %c0_40 = arith.constant 0 : index
    %111 = vector.load %arg4[%c0_38, %c0_39, %c0_40] : memref<1x1x128xf32, #tpu.memory_space<vmem>>, vector<1x1x128xf32>
    %112 = vector.shape_cast %111 : vector<1x1x128xf32> to vector<1x128xf32>
    %113 = vector.shape_cast %47#5 : vector<1x128xf32> to vector<1x1x128xf32>
    tpu.vector_store %arg4[%c0_38, %c0_39, %c0_40], %113 {strides = array<i32>} : memref<1x1x128xf32, #tpu.memory_space<vmem>>, vector<1x1x128xf32>,
    %c0_41 = arith.constant 0 : index
    %c0_42 = arith.constant 0 : index
    %c0_43 = arith.constant 0 : index
    %114 = vector.load %arg5[%c0_41, %c0_42, %c0_43] : memref<1x1x128xi32, #tpu.memory_space<vmem>>, vector<1x1x128xi32>
    %115 = vector.shape_cast %114 : vector<1x1x128xi32> to vector<1x128xi32>
    %116 = vector.shape_cast %47#6 : vector<1x128xi32> to vector<1x1x128xi32>
    tpu.vector_store %arg5[%c0_41, %c0_42, %c0_43], %116 {strides = array<i32>} : memref<1x1x128xi32, #tpu.memory_space<vmem>>, vector<1x1x128xi32>,
    %117 = arith.mulf %79, %110 : vector<4x128xf32>
    %c0_44 = arith.constant 0 : index
    %c0_45 = arith.constant 0 : index
    %c0_46 = arith.constant 0 : index
    %118 = vector.load %arg6[%c0_44, %c0_45, %c0_46] : memref<1x4x128xf32, #tpu.memory_space<vmem>>, vector<1x4x128xf32>
    %119 = vector.shape_cast %118 : vector<1x4x128xf32> to vector<4x128xf32>
    %120 = vector.shape_cast %117 : vector<4x128xf32> to vector<1x4x128xf32>
    tpu.vector_store %arg6[%c0_44, %c0_45, %c0_46], %120 {strides = array<i32>} : memref<1x4x128xf32, #tpu.memory_space<vmem>>, vector<1x4x128xf32>,
    return
  }
  func.func @transform_0(%arg0: i32, %arg1: memref<4xi32, #tpu.memory_space<smem>>) -> (i32, i32, i32) {
    %c0_i32 = arith.constant 0 : i32
    %c0_i32_0 = arith.constant 0 : i32
    %c0_i32_1 = arith.constant 0 : i32
    return %arg0, %c0_i32, %c0_i32_0 : i32, i32, i32
  }
  func.func @transform_1(%arg0: i32, %arg1: memref<4xi32, #tpu.memory_space<smem>>) -> (i32, i32, i32) {
    %c0_i32 = arith.constant 0 : i32
    %c0_i32_0 = arith.constant 0 : i32
    %c0_i32_1 = arith.constant 0 : i32
    return %arg0, %c0_i32, %c0_i32_0 : i32, i32, i32
  }
  func.func @transform_2(%arg0: i32, %arg1: memref<4xi32, #tpu.memory_space<smem>>) -> (i32, i32, i32) {
    %c0_i32 = arith.constant 0 : i32
    %c0_i32_0 = arith.constant 0 : i32
    %c0_i32_1 = arith.constant 0 : i32
    return %arg0, %c0_i32, %c0_i32_0 : i32, i32, i32
  }
  func.func @transform_3(%arg0: i32, %arg1: memref<4xi32, #tpu.memory_space<smem>>) -> (i32, i32, i32) {
    %c0_i32 = arith.constant 0 : i32
    %c0_i32_0 = arith.constant 0 : i32
    %c0_i32_1 = arith.constant 0 : i32
    return %arg0, %c0_i32, %c0_i32_0 : i32, i32, i32
  }
  func.func @transform_4(%arg0: i32, %arg1: memref<4xi32, #tpu.memory_space<smem>>) -> (i32, i32, i32) {
    %c0_i32 = arith.constant 0 : i32
    %c0_i32_0 = arith.constant 0 : i32
    %c0_i32_1 = arith.constant 0 : i32
    return %arg0, %c0_i32, %c0_i32_0 : i32, i32, i32
  }
}

</mosaic_0001>

<bundles_post_ra>
// kernel: tpu_custom_call.1
= control target key start
LH: loop header
LB: loop body
LE: loop exit
PB: predicated region body
PF: predicated region fallthrough
CT: control target
= control target key end

     0   :  { %s2013_s0 = inlined_call_operand.vmem [shape: s32[4], index: 0, kind: input, shape index: {}]   ;;  %s2014_s1 = inlined_call_operand.vmem [shape: f32[2,12,128], index: 1, kind: input, shape index: {}]   ;;  %s2015_s2 = inlined_call_operand.vmem [shape: f32[2,4,12], index: 2, kind: input, shape index: {}]   ;;  %s2016_s3 = inlined_call_operand.hbm [shape: f32[2,1,128], index: 3, kind: output, shape index: {0}]   ;;  %s2017_s4 = inlined_call_operand.hbm [shape: s32[2,1,128], index: 4, kind: output, shape index: {1}]   ;;  %s2018_s5 = inlined_call_operand.hbm [shape: f32[2,4,128], index: 5, kind: output, shape index: {2}]  }
   0x1   :  { %s11_s20 = sshll.u32 %s2013_s0, 4  ;;  %s12_s20 = int_to_ptr.vmem [resolvable:$true] %s11_s20 }
   0x2   :  { %s1292_s21 = scalar_lea.vmem %s12_s20, 16  ;;  %p1297_p1 = scmp.lt.s32.totalorder %s12_s20, %s12_s20 }
   0x3   :  { %p1293_p0 = scmp.ne.s32.totalorder %s12_s20, %s1292_s21  ;;  %p1298_p2 = scmp.lt.s32.totalorder %s1292_s21, %s1292_s21 }
   0x5   :  { %p1299_p3 = por %p1298_p2, %p1297_p1 }
   0x7   :  { %p1300_p4 = pnand %p1299_p3, %p1293_p0 }
   0x9   :  { %1303 = shalt.err (!%p1300_p4)  }
   0xa   :  { %s1550_s22 = smov [#allocation4]  }
   0xb   :  { %14 = dma.vmem_to_smem %s12_s20, 16, %s1550_s22, [#allocation3] }
   0xc   :  { %1464 = dma.done.wait [#allocation3], 16 }
   0xd   :  { %1465 = vsyncadd [#allocation3], 4294967280 }
   0xe   :  { %16 = sfence }
   0xf   :  { %17 = vsyncpa [#allocation6], 0 }
  0x10   :  { %19 = vsyncpa [#allocation6 + $0x1], 0 }
  0x11   :  { %20 = vsyncpa [#allocation8], 0 }
  0x12   :  { %22 = vsyncpa [#allocation8 + $0x1], 0  ;;  %s1591_s23 = smov 0   ;;  %s1593_s0 = smov 0  }
  0x13   :  { %s1595_s24 = smov 0   ;;  %s1597_s25 = smov 0  }
  0x14 LB: > { %s1612_s26 = sadd.s32 4294967295, %s1488_s25   ;;  %s1034_s27 = sadd.s32 4294967294, %s1488_s25   ;;  %s1488_s25 = sphi %s1597_s25, %s2034_s25   ;;  %s1484_s24 = sphi %s1595_s24, %s2033_s24   ;;  %s1480_s0 = sphi %s1593_s0, %s2032_s0   ;;  %s1476_s23 = sphi %s1591_s23, %s2031_s23  }
  0x15   : > { %s1616_s28 = sadd.s32 1, %s1488_s25   ;;  %s87_s29 = sadd.s32 1, %s1484_s24 }
  0x16   : > { %s84_s30 = ssub.s32 %s1488_s25, %s1616_s28  ;;  %p97_p5 = scmp.ne.s32.totalorder %s1484_s24, %s1480_s0 }
  0x17   : > { %p85_p6 = scmp.eq.s32.totalorder %s84_s30, 0  ;;  %p98_p7 = scmp.eq.s32.totalorder %s1612_s26, 1 }
  0x18   : > { %p103_p8 = scmp.ne.s32.totalorder %s1480_s0, %s1476_s23  ;;  %p104_p9 = scmp.eq.s32.totalorder %s1034_s27, 1 }
  0x19   : > { %s1629_s6 = scalar_select %p85_p6, %s1484_s24, %s87_s29  }
  0x1a   : > { %p1631_p10 = por %p98_p7, %p97_p5  ;;  %p1635_p11 = por %p104_p9, %p103_p8 }
  0x1b   : > { %p1037_p12 = scmp.ge.s32.totalorder %s1488_s25, 1  ;;  %p189_p13 = scmp.lt.s32.totalorder %s1488_s25, 3 }
  0x1d   : > { %p190_p0 = pnand %p1037_p12, %p189_p13 }
  0x1e   : > { %p227_p1 = scmp.lt.s32.totalorder (!%p190_p0), %s1612_s26, 1  ;;  %v236_v8 = vlaneseq (!%p190_p0)  ;;  %vm259_vm1 = vcmask (!%p190_p0), 1043456   ;;  %vm349_vm3 = vcmask (!%p190_p0), 130112   ;;  %s1686_s18 = sand.u32 (!%p190_p0), 1, %s1480_s0  }
  0x1f   : > { %193 = sbr.rel (%p190_p0) target bundleno = 3351 (0xd17), region = 28  ;;  %s1038_s19 = sshll.u32 (!%p190_p0), %s1686_s18, 2 }
  0x20   : > { %v1651_v9 = vand.u32 (!%p190_p0), 127, %v236_v8  ;;  %v1655_v15 = vshrl.u32 (!%p190_p0), %v236_v8, 7  ;;  %s213_s20 = scalar_lea.vmem (!%p190_p0), [#allocation5], %s1686_s18  ;;  %s219_s21 = scalar_lea.vmem (!%p190_p0), [#allocation7], %s1686_s18 }
  0x21   : > { %s1694_s22 = scalar_lea.vmem (!%p190_p0), [#allocation9], %s1038_s19  ;;  %s1713_s29 = smov (!%p190_p0), 0  }
  0x22   : > { %vm238_vm0 = vcmp.lt.s32.totalorder (!%p190_p0), %v1651_v9, 20  ;;  %v344_v16 = vadd.s32 (!%p190_p0), 4294967288, %v1651_v9  ;;  %v1664_v20 = vsub.s32 (!%p190_p0), %v1651_v9, %v1655_v15 }
  0x24   : > { %v1659_v17 = vsub.s32 (!%p190_p0), %v344_v16, %v1655_v15 }
  0x26   : > { %s228_s9 = scalar_select %p227_p1, %s1612_s26, 1 }
  0x28   : > { %s1060_s10 = sshll.u32 %s228_s9, 4  ;;  %s1041_s11 = sshll.u32 %s228_s9, 2 }
  0x29   : > { %s231_s14 = scalar_lea.vmem %s2014_s1, %s1060_s10  ;;  %s1649_s17 = scalar_lea.vmem %s2015_s2, %s1041_s11 }
  0x2a   : > { %v240_v0 = vld [vmem:[%s231_s14 + $0x8] sm:$0xf]  ;;  %v239_v1 = vld [vmem:[%s231_s14] sm:$0xff] }
  0x2b   : > { %v1043_v2 = vmul.f32 -1.442695, %v240_v0  ;;  %v1042_v3 = vmul.f32 -1.442695, %v239_v1 }
  0x2d   : > { %1284 = vpow2.f32 %v1043_v2 }
  0x2e   : > { %1286 = vpow2.f32 %v1042_v3 }
  0x37   : > { %v1285_v4 = vpop.eup %1284 }
  0x38   : > { %v1287_v5 = vpop.eup %1286  ;;  %v248_v6 = vadd.f32 1.0, %v1285_v4 }
  0x39   : > { %v247_v7 = vadd.f32 1.0, %v1287_v5 }
  0x3a   : > { %1288 = vrcp.f32 %v248_v6 }
  0x3b   : > { %1290 = vrcp.f32 %v247_v7 }
  0x44   : > { %v1289_v10 = vpop.eup %1288 }
  0x45   : > { %v1291_v11 = vpop.eup %1290  ;;  %v254_v12 = vsel %vm238_vm0, %v1289_v10, -1.0 }
  0x46   : > { %v260_v13 = vsel %vm259_vm1, %v254_v12, -inf  ;;  %256 = vst [vmem:[#allocation2 + $0x8] sm:$0xf] %v254_v12  ;;  %v253_v14 = vsel %vm238_vm0, %v1291_v11, -1.0 }
  0x47   : > { %261 = vmax.xlane.f32.xlu0 %v260_v13  ;;  %255 = vst [vmem:[#allocation2] sm:$0xff] %v253_v14 }
  0x4b   : > { %257 = vmax.xlane.f32.xlu0 %v253_v14 }
  0xd4   : > { %v262_v18 = vpop.xlane.xlu0 %261 }
  0xd5   : > { %vm264_vm2 = vcmp.ge.f32.partialorder %v254_v12, %v262_v18  ;;  %v348_v19 = vrot.slane %v262_v18, %v1659_v17 }
  0xd6   : > { %v266_v21 = vsel %vm264_vm2, %v1651_v9, 128 }
  0xd7   : > { %v281_v22 = vsel %vm259_vm1, %v266_v21, 2147483647 }
  0xd8   : > { %v258_v23 = vpop.xlane.xlu0 %257  ;;  %v283_v24 = vshra.s32 %v281_v22, 16  ;;  %v282_v31 = vand.u32 65535, %v281_v22 }
  0xd9   : > { %vm263_vm4 = vcmp.ge.f32.partialorder %v253_v14, %v258_v23  ;;  %v343_v25 = vrot.slane %v258_v23, %v1664_v20 }
  0xda   : > { %v265_v26 = vsel %vm263_vm4, %v1651_v9, 128  ;;  %v285_v27 = vcvt.s32.f32 %v283_v24  ;;  %v284_v33 = vcvt.s32.f32 %v282_v31  ;;  %v1700_v31 = vmov 0.0  }
  0xdb   : > { %v1671_v28 = vsel %vm349_vm3, %v348_v19, %v343_v25   ;;  %v268_v29 = vshra.s32 %v265_v26, 16  ;;  %v267_v34 = vand.u32 65535, %v265_v26 }
  0xdc   : > { %286 = vmin.xlane.f32.xlu1 %v285_v27 }
  0xdd   : > { %v270_v30 = vcvt.s32.f32 %v268_v29  ;;  %v269_v37 = vcvt.s32.f32 %v267_v34  ;;  %v1696_v29 = vmov 0  }
  0xe0   : > { %271 = vmin.xlane.f32.xlu1 %v270_v30 }
 0x169   : > { %v287_v32 = vpop.xlane.xlu1 %286 }
 0x16a   : > { %vm288_vm5 = vcmp.eq.f32.partialorder %v285_v27, %v287_v32  ;;  %v293_v39 = vcvt.f32.s32 %v287_v32  ;;  %v1702_v32 = vmov 1  }
 0x16b   : > { %v289_v35 = vsel %vm288_vm5, %v284_v33, inf }
 0x16c   : > { %290 = vmin.xlane.f32.xlu0 %v289_v35  ;;  %v294_v41 = vshll.u32 %v293_v39, 16 }
 0x16d   : > { %v272_v36 = vpop.xlane.xlu1 %271 }
 0x16e   : > { %vm273_vm6 = vcmp.eq.f32.partialorder %v270_v30, %v272_v36  ;;  %v278_v42 = vcvt.f32.s32 %v272_v36  ;;  %v1698_v30 = vmov 0  }
 0x16f   : > { %v274_v38 = vsel %vm273_vm6, %v269_v37, inf }
 0x170   : > { %275 = vmin.xlane.f32.xlu1 %v274_v38  ;;  %v279_v46 = vshll.u32 %v278_v42, 16 }
 0x1f9   : > { %v291_v40 = vpop.xlane.xlu0 %290 }
 0x1fa   : > { %v292_v43 = vcvt.f32.s32 %v291_v40 }
 0x1fc   : > { %v295_v44 = vadd.s32 %v294_v41, %v292_v43 }
 0x1fd   : > { %v276_v45 = vpop.xlane.xlu1 %275 }
 0x1fe   : > { %v359_v47 = vrot.slane %v295_v44, %v1659_v17  ;;  %v277_v48 = vcvt.f32.s32 %v276_v45  ;;  %vm297_vm7 = vcmp.eq.s32.totalorder %v1651_v9, %v295_v44 }
 0x1ff   : > { %v299_v49 = vsel %vm297_vm7, -1.0, %v254_v12 }
 0x200   : > { %v280_v50 = vadd.s32 %v279_v46, %v277_v48  ;;  %v302_v51 = vsel %vm259_vm1, %v299_v49, -inf }
 0x201   : > { %303 = vmax.xlane.f32.xlu0 %v302_v51 }
 0x202   : > { %v355_v52 = vrot.slane %v280_v50, %v1664_v20  ;;  %vm296_vm8 = vcmp.eq.s32.totalorder %v1651_v9, %v280_v50 }
 0x203   : > { %v298_v53 = vsel %vm296_vm8, -1.0, %v253_v14 }
 0x204   : > { %v360_v54 = vsel %vm349_vm3, %v359_v47, %v355_v52   ;;  %300 = vmax.xlane.f32.xlu1 %v298_v53 }
 0x28e   : > { %v304_v55 = vpop.xlane.xlu0 %303 }
 0x28f   : > { %vm306_vm9 = vcmp.ge.f32.partialorder %v299_v49, %v304_v55  ;;  %v370_v59 = vrot.slane %v304_v55, %v1659_v17 }
 0x290   : > { %v308_v56 = vsel %vm306_vm9, %v1651_v9, 128 }
 0x291   : > { %v301_v57 = vpop.xlane.xlu1 %300  ;;  %v323_v58 = vsel %vm259_vm1, %v308_v56, 2147483647 }
 0x292   : > { %vm305_vm10 = vcmp.ge.f32.partialorder %v298_v53, %v301_v57  ;;  %v366_v60 = vrot.slane %v301_v57, %v1664_v20  ;;  %v325_v61 = vshra.s32 %v323_v58, 16  ;;  %v324_v3 = vand.u32 65535, %v323_v58 }
 0x293   : > { %v307_v62 = vsel %vm305_vm10, %v1651_v9, 128 }
 0x294   : > { %v371_v63 = vsel %vm349_vm3, %v370_v59, %v366_v60   ;;  %v327_v0 = vcvt.s32.f32 %v325_v61  ;;  %v310_v1 = vshra.s32 %v307_v62, 16  ;;  %v309_v4 = vand.u32 65535, %v307_v62 }
 0x295   : > { %v326_v6 = vcvt.s32.f32 %v324_v3 }
 0x296   : > { %328 = vmin.xlane.f32.xlu1 %v327_v0  ;;  %v312_v2 = vcvt.s32.f32 %v310_v1  ;;  %v311_v10 = vcvt.s32.f32 %v309_v4 }
 0x298   : > { %313 = vmin.xlane.f32.xlu0 %v312_v2 }
 0x323   : > { %v329_v5 = vpop.xlane.xlu1 %328 }
 0x324   : > { %vm330_vm11 = vcmp.eq.f32.partialorder %v327_v0, %v329_v5  ;;  %v335_v12 = vcvt.f32.s32 %v329_v5 }
 0x325   : > { %v314_v7 = vpop.xlane.xlu0 %313  ;;  %v331_v8 = vsel %vm330_vm11, %v326_v6, inf }
 0x326   : > { %332 = vmin.xlane.f32.xlu1 %v331_v8  ;;  %vm315_vm12 = vcmp.eq.f32.partialorder %v312_v2, %v314_v7  ;;  %v320_v13 = vcvt.f32.s32 %v314_v7  ;;  %v336_v16 = vshll.u32 %v335_v12, 16 }
 0x327   : > { %v316_v11 = vsel %vm315_vm12, %v311_v10, inf }
 0x328   : > { %317 = vmin.xlane.f32.xlu0 %v316_v11  ;;  %v321_v21 = vshll.u32 %v320_v13, 16 }
 0x3b3   : > { %v333_v14 = vpop.xlane.xlu1 %332 }
 0x3b4   : > { %v334_v18 = vcvt.f32.s32 %v333_v14 }
 0x3b5   : > { %v318_v19 = vpop.xlane.xlu0 %317 }
 0x3b6   : > { %v337_v22 = vadd.s32 %v336_v16, %v334_v18  ;;  %v319_v23 = vcvt.f32.s32 %v318_v19 }
 0x3b8   : > { %v322_v24 = vadd.s32 %v321_v21, %v319_v23  ;;  %v380_v25 = vrot.slane %v337_v22, %v1659_v17 }
 0x3ba   : > { %v376_v26 = vrot.slane %v322_v24, %v1664_v20 }
 0x3bc   : > { %v381_v27 = vsel %vm349_vm3, %v380_v25, %v376_v26  }
 0x3bd LB: >> { %vm396_vm13 = vcmask 90112   ;;  %v458_v39 = vstv %s1524_s29  ;;  %vm470_vm5 = vcmask 97280   ;;  %s1791_s15 = smov 0   ;;  %s1793_s16 = smov 0   ;;  %s1524_s29 = sphi %s1713_s29, %s387_s29   ;;  %v1520_v28 = vphi %v1671_v28, %v614_v28   ;;  %v1516_v54 = vphi %v360_v54, %v616_v54   ;;  %v1512_v63 = vphi %v371_v63, %v618_v63   ;;  %v1508_v27 = vphi %v381_v27, %v620_v27   ;;  %v1504_v32 = vphi %v1702_v32, %v622_v32   ;;  %v1500_v31 = vphi %v1700_v31, %v2030_v31   ;;  %v1496_v30 = vphi %v1698_v30, %v2029_v30   ;;  %v1492_v29 = vphi %v1696_v29, %v2028_v29  }
 0x3be   : >> { %v397_v17 = vsel %vm396_vm13, %v1520_v28, -inf  ;;  %vm1742_vm14 = vcmp.eq.s32.totalorder %v1651_v9, %v458_v39 }
 0x3bf   : >> { %398 = vmax.xlane.f32.xlu0 %v397_v17 }
 0x44c   : >> { %v399_v20 = vpop.xlane.xlu0 %398 }
 0x44d   : >> { %v400_v33 = vrot.slane %v399_v20, 4 }
 0x44f   : >> { %v401_v34 = vmax.f32 %v399_v20, %v400_v33 }
 0x451   : >> { %v402_v35 = vrot.slane %v401_v34, 2 }
 0x453   : >> { %v403_v36 = vmax.f32 %v401_v34, %v402_v35 }
 0x455   : >> { %v404_v37 = vrot.slane %v403_v36, 1 }
 0x457   : >> { %v405_v38 = vmax.f32 %v403_v36, %v404_v37 }
 0x459   : >> { %1090 = vpush %v405_v38 }
 0x48a   : >> { %s1091_s30 = spop %1090 }
 0x48b   : >> { %v407_v41 = vstv %s1091_s30 }
 0x48c   : >> { %vm408_vm15 = vcmp.ge.f32.partialorder %v1520_v28, %v407_v41  ;;  %v1749_v31 = vsel %vm1742_vm14, %v407_v41, %v1500_v31  }
 0x48d   : >> { %v2023_v42 = vmov %v1749_v31  ;;  %v409_v43 = vsel %vm408_vm15, %v1651_v9, 12 }
 0x48e   : >> { %v410_v44 = vsel %vm396_vm13, %v409_v43, 2147483647 }
 0x48f   : >> { %v412_v45 = vshra.s32 %v410_v44, 16  ;;  %v411_v47 = vand.u32 65535, %v410_v44 }
 0x491   : >> { %v414_v46 = vcvt.s32.f32 %v412_v45  ;;  %v413_v49 = vcvt.s32.f32 %v411_v47 }
 0x493   : >> { %415 = vmin.xlane.f32.xlu0 %v414_v46 }
 0x520   : >> { %v416_v48 = vpop.xlane.xlu0 %415 }
 0x521   : >> { %vm417_vm0 = vcmp.eq.f32.partialorder %v414_v46, %v416_v48  ;;  %v422_v51 = vcvt.f32.s32 %v416_v48 }
 0x522   : >> { %v418_v50 = vsel %vm417_vm0, %v413_v49, inf }
 0x523   : >> { %419 = vmin.xlane.f32.xlu1 %v418_v50  ;;  %v423_v53 = vshll.u32 %v422_v51, 16 }
 0x5b0   : >> { %v420_v52 = vpop.xlane.xlu1 %419 }
 0x5b1   : >> { %v421_v55 = vcvt.f32.s32 %v420_v52 }
 0x5b3   : >> { %v424_v56 = vadd.s32 %v423_v53, %v421_v55 }
 0x5b5   : >> { %v425_v57 = vrot.slane %v424_v56, 4 }
 0x5b7   : >> { %vm426_vm2 = vcmp.lt.s32.totalorder %v424_v56, %v425_v57 }
 0x5b8   : >> { %v427_v58 = vsel %vm426_vm2, %v424_v56, %v425_v57 }
 0x5b9   : >> { %v428_v59 = vrot.slane %v427_v58, 2 }
 0x5bb   : >> { %vm429_vm3 = vcmp.lt.s32.totalorder %v427_v58, %v428_v59 }
 0x5bc   : >> { %v430_v60 = vsel %vm429_vm3, %v427_v58, %v428_v59 }
 0x5bd   : >> { %v431_v61 = vrot.slane %v430_v60, 1 }
 0x5bf   : >> { %vm432_vm4 = vcmp.lt.s32.totalorder %v430_v60, %v431_v61 }
 0x5c0   : >> { %v433_v62 = vsel %vm432_vm4, %v430_v60, %v431_v61 }
 0x5c1   : >> { %1092 = vpush %v433_v62 }
 0x5f2   : >> { %s1753_s9 = spop %1092 }
 0x5f3   : >> { %v435_v0 = vstv %s1753_s9  ;;  %s464_s12 = scalar_lea.vmem [#allocation2], %s1753_s9 }
 0x5f4   : >> { %vm1757_vm6 = vcmp.eq.s32.totalorder %v1651_v9, %v435_v0  ;;  %v1763_v29 = vsel %vm1742_vm14, %v435_v0, %v1492_v29   ;;  %v465_v41 = vld [vmem:[%s464_s12] sm:$0x1] }
 0x5f5   : >> { %v2026_v2 = vmov %v1763_v29  ;;  %v437_v3 = vsel %vm1757_vm6, %v1516_v54, 0  ;;  %v469_v4 = vsel %vm1757_vm6, %v1504_v32, 0 }
 0x5f6   : >> { %v438_v5 = vsel %vm396_vm13, %v437_v3, 0  ;;  %v471_v6 = vsel %vm470_vm5, %v469_v4, 0 }
 0x5f7   : >> { %v440_v7 = vshrl.u32 %v438_v5, 16  ;;  %v439_v8 = vand.u32 65535, %v438_v5  ;;  %v473_v12 = vshrl.u32 %v471_v6, 16  ;;  %v472_v13 = vand.u32 65535, %v471_v6 }
 0x5f9   : >> { %v442_v10 = vcvt.s32.f32 %v440_v7  ;;  %v441_v11 = vcvt.s32.f32 %v439_v8  ;;  %v475_v14 = vcvt.s32.f32 %v473_v12  ;;  %v474_v16 = vcvt.s32.f32 %v472_v13 }
 0x5fb   : >> { %445 = vadd.xlane.f32.xlu1 %v442_v10  ;;  %443 = vadd.xlane.f32.xlu0 %v441_v11 }
 0x5ff   : >> { %478 = vadd.xlane.f32.xlu1 %v475_v14  ;;  %476 = vadd.xlane.f32.xlu0 %v474_v16 }
 0x688   : >> { %v446_v18 = vpop.xlane.xlu1 %445  ;;  %v444_v19 = vpop.xlane.xlu0 %443 }
 0x689   : >> { %v448_v21 = vcvt.f32.s32 %v446_v18  ;;  %v447_v23 = vcvt.f32.s32 %v444_v19 }
 0x68b   : >> { %v449_v22 = vshll.u32 %v448_v21, 16 }
 0x68c   : >> { %v479_v26 = vpop.xlane.xlu1 %478  ;;  %v477_v20 = vpop.xlane.xlu0 %476 }
 0x68d   : >> { %v450_v24 = vadd.s32 %v449_v22, %v447_v23  ;;  %v481_v31 = vcvt.f32.s32 %v479_v26  ;;  %v480_v36 = vcvt.f32.s32 %v477_v20 }
 0x68f   : >> { %v451_v25 = vrot.slane %v450_v24, 4  ;;  %v482_v34 = vshll.u32 %v481_v31, 16 }
 0x691   : >> { %v452_v29 = vadd.s32 %v451_v25, %v450_v24  ;;  %v483_v38 = vadd.s32 %v482_v34, %v480_v36 }
 0x693   : >> { %v453_v17 = vrot.slane %v452_v29, 2 }
 0x695   : >> { %v454_v33 = vadd.s32 %v453_v17, %v452_v29 }
 0x697   : >> { %v455_v35 = vrot.slane %v454_v33, 1 }
 0x699   : >> { %v456_v37 = vadd.s32 %v455_v35, %v454_v33 }
 0x69b   : >> { %1094 = vpush %v456_v37 }
 0x69c   : >> { %1096 = vpush %v483_v38 }
 0x6cc   : >> { %s1095_s10 = spop %1094 }
 0x6cd   : >> { %v461_v39 = vstv %s1095_s10  ;;  %s1773_s11 = spop %1096 }
 0x6ce   : >> { %v1779_v30 = vsel %vm1742_vm14, %v461_v39, %v1496_v30   ;;  %vm466_vm7 = vcmp.eq.s32.totalorder %v1651_v9, %v461_v39  ;;  %p485_p2 = scmp.gt.s32.totalorder %s1773_s11, 0  ;;  %p1044_p4 = scmp.le.s32.totalorder %s1773_s11, 0 }
 0x6cf   : >> { %v2027_v43 = vmov %v1779_v30  ;;  %v1783_v44 = vsel %vm466_vm7, -1.0, %v465_v41  ;;  %v503_v30 = vsel (!%p1044_p4), %vm1757_vm6, %v1508_v27, 0  ;;  %v492_v40 = vsel (!%p1044_p4), %vm1757_vm6, %v1512_v63, 0.0 }
 0x6d0   : >> { %468 = vst [vmem:[%s464_s12] sm:$0x1] %v1783_v44  ;;  %s486_s13 = scalar_select %p485_p2, 1, 0 }
 0x6d1   : >> { %491 = sbr.rel (%p1044_p4) target bundleno = 1963 (0x7ab), region = 39  ;;  %v504_v45 = vsel (!%p1044_p4), %vm396_vm13, %v503_v30, 0  ;;  %v493_v46 = vsel (!%p1044_p4), %vm396_vm13, %v492_v40, 0.0 }
 0x6d2   : >> { %p487_p3 = scmp.eq.s32.totalorder %s486_s13, 0  ;;  %v506_v47 = vshrl.u32 (!%p1044_p4), %v504_v45, 16  ;;  %494 = vadd.xlane.f32.xlu1 (!%p1044_p4), %v493_v46  ;;  %v505_v48 = vand.u32 (!%p1044_p4), 65535, %v504_v45 }
 0x6d4   : >> { %s1788_s14 = scalar_select %p487_p3, 1, 0 }
 0x6d5   : >> { %v508_v49 = vcvt.s32.f32 (!%p1044_p4), %v506_v47  ;;  %v507_v50 = vcvt.s32.f32 (!%p1044_p4), %v505_v48 }
 0x6d7   : >> { %511 = vadd.xlane.f32.xlu0 (!%p1044_p4), %v508_v49 }
 0x6db   : >> { %509 = vadd.xlane.f32.xlu0 %v507_v50 }
 0x75f   : >> { %v495_v51 = vpop.xlane.xlu1 %494 }
 0x760   : >> { %v496_v52 = vrot.slane %v495_v51, 4 }
 0x762   : >> { %v497_v53 = vadd.f32 %v496_v52, %v495_v51 }
 0x764   : >> { %v512_v55 = vpop.xlane.xlu0 %511  ;;  %v498_v57 = vrot.slane %v497_v53, 2 }
 0x765   : >> { %v514_v56 = vcvt.f32.s32 %v512_v55 }
 0x766   : >> { %v499_v58 = vadd.f32 %v498_v57, %v497_v53 }
 0x767   : >> { %v515_v60 = vshll.u32 %v514_v56, 16 }
 0x768   : >> { %v510_v59 = vpop.xlane.xlu0 %509  ;;  %v500_v62 = vrot.slane %v499_v58, 1 }
 0x769   : >> { %v513_v61 = vcvt.f32.s32 %v510_v59 }
 0x76a   : >> { %v501_v3 = vadd.f32 %v500_v62, %v499_v58 }
 0x76b   : >> { %v516_v0 = vadd.s32 %v515_v60, %v513_v61 }
 0x76c   : >> { %1098 = vpush %v501_v3 }
 0x76d   : >> { %v517_v4 = vrot.slane %v516_v0, 4 }
 0x76f   : >> { %v518_v5 = vadd.s32 %v517_v4, %v516_v0 }
 0x771   : >> { %v519_v6 = vrot.slane %v518_v5, 2 }
 0x773   : >> { %v520_v7 = vadd.s32 %v519_v6, %v518_v5 }
 0x775   : >> { %v521_v8 = vrot.slane %v520_v7, 1 }
 0x777   : >> { %v522_v10 = vadd.s32 %v521_v8, %v520_v7 }
 0x779   : >> { %1100 = vpush %v522_v10 }
 0x79d   : >> { %s1099_s16 = spop %1098  }
 0x7aa   : >> { %s1101_s15 = spop %1100  }
 0x7ab PF: >> { %s1809_s19 = smov 0   ;;  %s1811_s30 = smov -1.0   ;;  %vm529_vm8 = vcmask (!%p485_p2), 1040384   ;;  %s1532_s16 = sphi %s1793_s16, %s1099_s16   ;;  %s1528_s15 = sphi %s1791_s15, %s1101_s15  }
 0x7ac   : >> { %528 = sbr.rel (%p485_p2) target bundleno = 3097 (0xc19), region = 43  ;;  %v530_v11 = vsel (!%p485_p2), %vm529_vm8, %v1783_v44, -inf }
 0x7ad   : >> { %531 = vmax.xlane.f32.xlu0 (!%p485_p2), %v530_v11 }
 0x83a   : >> { %v532_v12 = vpop.xlane.xlu0 %531 }
 0x83b   : >> { %v533_v13 = vrot.slane %v532_v12, 4 }
 0x83d   : >> { %v534_v14 = vmax.f32 %v532_v12, %v533_v13 }
 0x83f   : >> { %v535_v16 = vrot.slane %v534_v14, 2 }
 0x841   : >> { %v536_v18 = vmax.f32 %v534_v14, %v535_v16 }
 0x843   : >> { %v537_v19 = vrot.slane %v536_v18, 1 }
 0x845   : >> { %v538_v21 = vmax.f32 %v536_v18, %v537_v19 }
 0x847   : >> { %1102 = vpush %v538_v21 }
 0x878   : >> { %s1821_s16 = spop %1102  }
 0x879   : >> { %v540_v22 = vstv %s1821_s16 }
 0x87a   : >> { %vm541_vm9 = vcmp.ge.f32.partialorder %v1783_v44, %v540_v22 }
 0x87b   : >> { %v542_v23 = vsel %vm541_vm9, %v1651_v9, 128 }
 0x87c   : >> { %v543_v24 = vsel %vm529_vm8, %v542_v23, 2147483647 }
 0x87d   : >> { %v545_v25 = vshra.s32 %v543_v24, 16  ;;  %v544_v29 = vand.u32 65535, %v543_v24 }
 0x87f   : >> { %v547_v26 = vcvt.s32.f32 %v545_v25  ;;  %v546_v17 = vcvt.s32.f32 %v544_v29 }
 0x881   : >> { %548 = vmin.xlane.f32.xlu0 %v547_v26 }
 0x90e   : >> { %v549_v31 = vpop.xlane.xlu0 %548 }
 0x90f   : >> { %vm550_vm10 = vcmp.eq.f32.partialorder %v547_v26, %v549_v31  ;;  %v555_v33 = vcvt.f32.s32 %v549_v31 }
 0x910   : >> { %v551_v20 = vsel %vm550_vm10, %v546_v17, inf }
 0x911   : >> { %552 = vmin.xlane.f32.xlu1 %v551_v20  ;;  %v556_v35 = vshll.u32 %v555_v33, 16 }
 0x99e   : >> { %v553_v34 = vpop.xlane.xlu1 %552 }
 0x99f   : >> { %v554_v36 = vcvt.f32.s32 %v553_v34 }
 0x9a1   : >> { %v557_v37 = vadd.s32 %v556_v35, %v554_v36 }
 0x9a3   : >> { %v558_v38 = vrot.slane %v557_v37, 4 }
 0x9a5   : >> { %vm559_vm11 = vcmp.lt.s32.totalorder %v557_v37, %v558_v38 }
 0x9a6   : >> { %v560_v39 = vsel %vm559_vm11, %v557_v37, %v558_v38 }
 0x9a7   : >> { %v561_v41 = vrot.slane %v560_v39, 2 }
 0x9a9   : >> { %vm562_vm12 = vcmp.lt.s32.totalorder %v560_v39, %v561_v41 }
 0x9aa   : >> { %v563_v30 = vsel %vm562_vm12, %v560_v39, %v561_v41 }
 0x9ab   : >> { %v564_v40 = vrot.slane %v563_v30, 1 }
 0x9ad   : >> { %vm565_vm13 = vcmp.lt.s32.totalorder %v563_v30, %v564_v40 }
 0x9ae   : >> { %v566_v45 = vsel %vm565_vm13, %v563_v30, %v564_v40 }
 0x9af   : >> { %1104 = vpush %v566_v45 }
 0x9e0   : >> { %s1827_s15 = spop %1104  }
 0x9e1   : >> { %v568_v46 = vstv %s1827_s15 }
 0x9e2   : >> { %vm569_vm14 = vcmp.eq.s32.totalorder %v1651_v9, %v568_v46 }
 0x9e3   : >> { %v570_v47 = vsel %vm569_vm14, -1.0, %v1783_v44 }
 0x9e4   : >> { %v571_v48 = vsel %vm529_vm8, %v570_v47, -inf }
 0x9e5   : >> { %572 = vmax.xlane.f32.xlu1 %v571_v48 }
 0xa72   : >> { %v573_v49 = vpop.xlane.xlu1 %572 }
 0xa73   : >> { %v574_v50 = vrot.slane %v573_v49, 4 }
 0xa75   : >> { %v575_v51 = vmax.f32 %v573_v49, %v574_v50 }
 0xa77   : >> { %v576_v52 = vrot.slane %v575_v51, 2 }
 0xa79   : >> { %v577_v53 = vmax.f32 %v575_v51, %v576_v52 }
 0xa7b   : >> { %v578_v55 = vrot.slane %v577_v53, 1 }
 0xa7d   : >> { %v579_v56 = vmax.f32 %v577_v53, %v578_v55 }
 0xa7f   : >> { %1106 = vpush %v579_v56 }
 0xab0   : >> { %s1833_s30 = spop %1106  }
 0xab1   : >> { %v581_v57 = vstv %s1833_s30 }
 0xab2   : >> { %vm582_vm15 = vcmp.ge.f32.partialorder %v570_v47, %v581_v57 }
 0xab3   : >> { %v583_v58 = vsel %vm582_vm15, %v1651_v9, 128 }
 0xab4   : >> { %v584_v44 = vsel %vm529_vm8, %v583_v58, 2147483647 }
 0xab5   : >> { %v586_v59 = vshra.s32 %v584_v44, 16  ;;  %v585_v61 = vand.u32 65535, %v584_v44 }
 0xab7   : >> { %v588_v60 = vcvt.s32.f32 %v586_v59  ;;  %v587_v0 = vcvt.s32.f32 %v585_v61 }
 0xab9   : >> { %589 = vmin.xlane.f32.xlu0 %v588_v60 }
 0xb46   : >> { %v590_v62 = vpop.xlane.xlu0 %589 }
 0xb47   : >> { %vm591_vm0 = vcmp.eq.f32.partialorder %v588_v60, %v590_v62  ;;  %v596_v4 = vcvt.f32.s32 %v590_v62 }
 0xb48   : >> { %v592_v3 = vsel %vm591_vm0, %v587_v0, inf }
 0xb49   : >> { %593 = vmin.xlane.f32.xlu1 %v592_v3  ;;  %v597_v6 = vshll.u32 %v596_v4, 16 }
 0xbd6   : >> { %v594_v5 = vpop.xlane.xlu1 %593 }
 0xbd7   : >> { %v595_v7 = vcvt.f32.s32 %v594_v5 }
 0xbd9   : >> { %v598_v8 = vadd.s32 %v597_v6, %v595_v7 }
 0xbdb   : >> { %v599_v10 = vrot.slane %v598_v8, 4 }
 0xbdd   : >> { %vm600_vm2 = vcmp.lt.s32.totalorder %v598_v8, %v599_v10 }
 0xbde   : >> { %v601_v11 = vsel %vm600_vm2, %v598_v8, %v599_v10 }
 0xbdf   : >> { %v602_v12 = vrot.slane %v601_v11, 2 }
 0xbe1   : >> { %vm603_vm3 = vcmp.lt.s32.totalorder %v601_v11, %v602_v12 }
 0xbe2   : >> { %v604_v13 = vsel %vm603_vm3, %v601_v11, %v602_v12 }
 0xbe3   : >> { %v605_v14 = vrot.slane %v604_v13, 1 }
 0xbe5   : >> { %vm606_vm4 = vcmp.lt.s32.totalorder %v604_v13, %v605_v14 }
 0xbe6   : >> { %v607_v16 = vsel %vm606_vm4, %v604_v13, %v605_v14 }
 0xbe7   : >> { %1108 = vpush %v607_v16 }
 0xc18   : >> { %s1109_s19 = spop %1108  }
 0xc19 PF: >> { %v613_v18 = vstv %s1548_s16  ;;  %v615_v19 = vstv %s1544_s15  ;;  %v617_v21 = vstv %s1540_s30  ;;  %v619_v22 = vstv %s1536_s19  ;;  %s387_s29 = sadd.s32 1, %s1524_s29   ;;  %s1548_s16 = sphi %s1532_s16, %s1821_s16   ;;  %s1544_s15 = sphi %s1528_s15, %s1827_s15   ;;  %s1540_s30 = sphi %s1811_s30, %s1833_s30   ;;  %s1536_s19 = sphi %s1809_s19, %s1109_s19  }
 0xc1a   : >> { %v614_v28 = vsel %vm1757_vm6, %v613_v18, %v1520_v28   ;;  %v616_v54 = vsel %vm1757_vm6, %v615_v19, %v1516_v54   ;;  %v618_v63 = vsel %vm1757_vm6, %v617_v21, %v1512_v63   ;;  %v620_v27 = vsel %vm1757_vm6, %v619_v22, %v1508_v27   ;;  %p384_p5 = scmp.ge.s32.totalorder %s387_s29, 40  }
 0xc1b   : >> { %v621_v23 = vstv %s1788_s14  ;;  %v2028_v29 = vmov %v2026_v2  ;;  %v2029_v30 = vmov %v2027_v43  ;;  %v2030_v31 = vmov %v2023_v42  ;;  %v623_v24 = vld [vmem:[%s1649_s17] sm:$0xf] (%p384_p5)  ;;  %829 = vst [vmem:[%s219_s21] sm:$0x1] (%p384_p5), %v2027_v43  ;;  %828 = vst [vmem:[%s213_s20] sm:$0x1] (%p384_p5), %v2023_v42  ;;  %s836_s17 = sand.u32 (%p384_p5), 1, %s1612_s26   ;;  %s1055_s29 = sshll.u32 (%p384_p5), %s1612_s26, 4 }
 0xc1c   : >> { %v622_v32 = vsel %vm1757_vm6, %v621_v23, %v1504_v32   ;;  %386 = sbr.rel (!%p384_p5) target bundleno = 957 (0x3bd), region = 114  ;;  %v646_v1 = vadd.s32 (%p384_p5), 8, %v1655_v15  ;;  %vm647_vm6 = vcmp.eq.s32.totalorder (%p384_p5), %v1655_v15, %v2026_v2  ;;  %v1551_v25 = vmov (%p384_p5), 0.0|0.0   ;;  %s1911_s11 = scalar_lea.hbm (%p384_p5), %s2017_s4, %s1055_s29 }
 0xc1d   : > { %1085 = vmatprep.subr.bf16.mxu0 (%p384_p5), %v1551_v25  ;;  %1081 = vmatprep.subr.bf16.mxu1 (%p384_p5), %v1551_v25  ;;  %v624_v28 = vmul.f32 (%p384_p5), 0.5, %v623_v24  ;;  %vm1552_vm8 = vmmov (%p384_p5), 0   ;;  %v1553_v9 = vmov (%p384_p5), 0.0   ;;  %vm1083_vm9 = vmpackc.low (%p384_p5), %vm259_vm1, %vm647_vm6  ;;  %v1554_v27 = vmov (%p384_p5), 1.0   ;;  %s867_s12 = sshll.u32 (%p384_p5), %s219_s21, 4  ;;  %s1920_s15 = scalar_lea.hbm (%p384_p5), %s2016_s3, %s1055_s29  ;;  %s1915_s12 = int_to_ptr.vmem [resolvable:$true] %s867_s12 }
 0xc1e   : > { %vm648_vm7 = vcmp.eq.s32.totalorder (%p384_p5), %v646_v1, %v2026_v2  ;;  %1078 = vmatprep.mubr.msk.f32.mxu0 (%p384_p5), %vm1552_vm8, %v1553_v9  ;;  %1071 = vmatprep.mubr.msk.f32.mxu1 (%p384_p5), %vm1552_vm8, %v1553_v9  ;;  %vm633_vm10 = vcmask (%p384_p5), 1041408   ;;  %vm635_vm11 = vcmask (%p384_p5), 1042432   ;;  %vm638_vm12 = vcmask (%p384_p5), 1044480   ;;  %s1922_s16 = scalar_lea.sflag (%p384_p5), [#allocation8], %s836_s17  ;;  %s1304_s19 = scalar_lea.vmem (%p384_p5), %s1915_s12, 16 }
 0xc1f   : > { %v1046_v54 = vsel (%p384_p5), %vm648_vm7, 1.0, %v1553_v9  ;;  %v626_v63 = vrot.slane (%p384_p5), %v624_v28, 2  ;;  %vm640_vm13 = vcmask (%p384_p5), 1045504   ;;  %vm642_vm14 = vcmask (%p384_p5), 1046528   ;;  %p1305_p6 = scmp.ne.s32.totalorder (%p384_p5), %s1915_s12, %s1304_s19  ;;  %s1555_s30 = smov (%p384_p5), [#allocation7]  }
 0xc20   : > { %v1082_v32 = vpack.c.bf16 (%p384_p5), %v1046_v54, %v1554_v27  ;;  %s1308_s9 = sshll.u32 (%p384_p5), %s1555_s30, 4  ;;  %s1309_s9 = int_to_ptr.vmem [resolvable:$false] %s1308_s9 }
 0xc21   : > { %v628_v43 = vsub.f32 (%p384_p5), %v623_v24, %v626_v63  ;;  %v629_v26 = vadd.f32 (%p384_p5), %v626_v63, %v623_v24  ;;  %p1306_p7 = pnand (%p384_p5), %p1305_p6, %p1631_p10  ;;  %s1310_s21 = scalar_lea.vmem (%p384_p5), %s1309_s9, 32 }
 0xc22   : > { %1088 = vmatpush3.bf16.msk.msra.mxu0 (%p384_p5), %vm1083_vm9, %v1082_v32  ;;  %1084 = vmatpush3.bf16.msk.msra.mxu1 (%p384_p5), %vm1083_vm9, %v1082_v32  ;;  %p1311_p9 = scmp.lt.s32.totalorder (%p384_p5), %s1915_s12, %s1309_s9  ;;  %p1312_p12 = scmp.lt.s32.totalorder (%p384_p5), %s1310_s21, %s1304_s19 }
 0xc23   : > { %v631_v42 = vrot.slane %v629_v26, 6  ;;  %p1307_p8 = pneg %p1306_p7 }
 0xc24   : > { %p1313_p13 = por %p1312_p12, %p1311_p9 }
 0xc25   : > { %v634_v2 = vsel %vm633_vm10, %v628_v43, %v631_v42 }
 0xc26   : > { %v636_v29 = vsel %vm635_vm11, %v634_v2, %v631_v42  ;;  %p1314_p0 = pnand %p1313_p13, %p1307_p8 }
 0xc27   : > { %v637_v31 = vsel %vm259_vm1, %v636_v29, 0.0 }
 0xc28   : > { %v639_v17 = vsel %vm638_vm12, %v637_v31, 0.0 }
 0xc29   : > { %v641_v20 = vsel %vm640_vm13, %v639_v17, 0.0 }
 0xc2a   : > { %v643_v33 = vsel %vm642_vm14, %v641_v20, 0.0 }
 0xc2b   : > { %v653_v34 = vpack.c.bf16 %v643_v33, %v643_v33 }
 0xc2d   : > { %v654_v35 = vunpack.c.l.bf16 %v653_v34 }
 0xc2f   : > { %1079 = vmatmul.mubr.msk.f32.vlgmr.msra.gmra.mrb[0].mxu0 %vm470_vm5, %v654_v35  ;;  %v655_v36 = vsub.f32 %v643_v33, %v654_v35 }
 0xc31   : > { %1072 = vmatmul.mubr.msk.f32.vlgmr.msra.gmra.mrb[0].mxu1 %vm470_vm5, %v655_v36 }
 0xc32   : > { %1317 = shalt.err (!%p1314_p0)
}
 0xc33   : > { %s1318_s17 = scalar_lea.hbm %s1911_s11, 16  ;;  %s1322_s13 = scalar_lea.hbm %s2017_s4, 32 }
 0xc34   : > { %p1319_p1 = scmp.ne.s32.totalorder %s1911_s11, %s1318_s17  ;;  %p1323_p4 = scmp.lt.u32.totalorder %s1911_s11, %s2017_s4 }
 0xc35   : > { %p1324_p5 = scmp.lt.u32.totalorder %s1322_s13, %s1318_s17  ;;  %p1326_p7 = scmp.lt.u32.totalorder %s1318_s17, %s1911_s11 }
 0xc36   : > { %p1320_p2 = pnand %p1319_p1, %p1631_p10 }
 0xc37   : > { %p1325_p6 = por %p1324_p5, %p1323_p4 }
 0xc38   : > { %p1321_p3 = pneg %p1320_p2 }
 0xc39   : > { %p1327_p8 = por %p1326_p7, %p1325_p6 }
 0xc3b   : > { %p1328_p9 = pnand %p1327_p8, %p1321_p3 }
 0xc3d   : > { %1331 = shalt.err (!%p1328_p9)
}
 0xc3e   : > { %1111 = dma.vmem_to_hbm [thread:$0]  (%p1631_p10), %s1915_s12, 16, %s1911_s11, %s1922_s16  }
 0xc3f   : > { %s854_s19 = sshll.u32 %s213_s20, 4  ;;  %s833_s9 = scalar_lea.sflag [#allocation6], %s1686_s18  ;;  %s855_s19 = int_to_ptr.vmem [resolvable:$true] %s854_s19 }
 0xc40   : > { %s1332_s21 = scalar_lea.vmem %s855_s19, 16  ;;  %s1556_s17 = smov [#allocation5]  }
 0xc41   : > { %p1333_p12 = scmp.ne.s32.totalorder %s855_s19, %s1332_s21  ;;  %s1336_s29 = sshll.u32 %s1556_s17, 4  ;;  %s1337_s29 = int_to_ptr.vmem [resolvable:$false] %s1336_s29 }
 0xc42   : > { %s1338_s10 = scalar_lea.vmem %s1337_s29, 32  ;;  %p1339_p1 = scmp.lt.s32.totalorder %s855_s19, %s1337_s29 }
 0xc43   : > { %p1334_p13 = pnand %p1333_p12, %p1631_p10  ;;  %p1340_p2 = scmp.lt.s32.totalorder %s1338_s10, %s1332_s21 }
 0xc45   : > { %p1335_p0 = pneg %p1334_p13  ;;  %p1341_p3 = por %p1340_p2, %p1339_p1 }
 0xc47   : > { %p1342_p4 = pnand %p1341_p3, %p1335_p0 }
 0xc49   : > { %1345 = shalt.err (!%p1342_p4)
}
 0xc4a   : > { %s1346_s18 = scalar_lea.hbm %s1920_s15, 16  ;;  %s1350_s12 = scalar_lea.hbm %s2016_s3, 32 }
 0xc4b   : > { %p1347_p5 = scmp.ne.s32.totalorder %s1920_s15, %s1346_s18  ;;  %p1351_p8 = scmp.lt.u32.totalorder %s1920_s15, %s2016_s3 }
 0xc4c   : > { %p1352_p9 = scmp.lt.u32.totalorder %s1350_s12, %s1346_s18  ;;  %p1354_p13 = scmp.lt.u32.totalorder %s1346_s18, %s1920_s15 }
 0xc4d   : > { %p1348_p6 = pnand %p1347_p5, %p1631_p10 }
 0xc4e   : > { %p1353_p12 = por %p1352_p9, %p1351_p8 }
 0xc4f   : > { %p1349_p7 = pneg %p1348_p6 }
 0xc50   : > { %p1355_p0 = por %p1354_p13, %p1353_p12 }
 0xc52   : > { %p1356_p1 = pnand %p1355_p0, %p1349_p7 }
 0xc54   : > { %1359 = shalt.err (!%p1356_p1)
}
 0xc55   : > { %1110 = dma.vmem_to_hbm [thread:$0]  (%p1631_p10), %s855_s19, 16, %s1920_s15, %s833_s9   ;;  %v816_v37 = vand.u32 1, %v1655_v15 }
 0xc56   : > { %s1053_s30 = sshll.u32 %s1612_s26, 1  ;;  %s1057_s18 = sshll.u32 %s1612_s26, 6 }
 0xc57   : > { %s809_s21 = sadd.s32 1, %s1053_s30  ;;  %s807_s17 = sld [smem:[#allocation4 + %s1053_s30]]  ;;  %vm824_vm1 = vcmp.eq.s32.totalorder %v816_v37, 0 }
 0xc58   : > { %s810_s29 = sld [smem:[#allocation4 + %s809_s21]]  ;;  %s880_s15 = sshll.u32 %s1694_s22, 4  ;;  %s881_s15 = int_to_ptr.vmem [resolvable:$true] %s880_s15 }
 0xc59   : > { %s1973_s11 = scalar_lea.hbm %s2018_s5, %s1057_s18  ;;  %s1360_s12 = scalar_lea.vmem %s881_s15, 64 }
 0xc5a   : > { %p1361_p2 = scmp.ne.s32.totalorder %s881_s15, %s1360_s12  ;;  %s1557_s13 = smov [#allocation9]  }
 0xc5b   : > { %s1364_s14 = sshll.u32 %s1557_s13, 4  ;;  %s1365_s14 = int_to_ptr.vmem [resolvable:$false] %s1364_s14 }
 0xc5c   : > { %p1362_p3 = pnand %p1361_p2, %p1631_p10  ;;  %s1366_s26 = scalar_lea.vmem %s1365_s14, 128 }
 0xc5d   : > { %s808_s10 = scvt.s32.f32 %s807_s17  ;;  %p1367_p5 = scmp.lt.s32.totalorder %s881_s15, %s1365_s14 }
 0xc5e   : > { %s811_s20 = scvt.s32.f32 %s810_s29  ;;  %p1363_p4 = pneg %p1362_p3 }
 0xc5f   : > { %v826_v39 = vstv %s808_s10  ;;  %p1368_p6 = scmp.lt.s32.totalorder %s1366_s26, %s1360_s12 }
 0xc60   : > { %v825_v38 = vstv %s811_s20 }
 0xc61   : > { %v827_v45 = vsel %vm824_vm1, %v825_v38, %v826_v39  ;;  %p1369_p7 = por %p1368_p6, %p1367_p5 }
 0xc63   : > { %p1370_p8 = pnand %p1369_p7, %p1363_p4 }
 0xd02   : > { %v802_v41 = vpop.f32.mrb[0].mxu0 }
 0xd03   : > { %v1080_v30 = vpop.f32.mrb[1].mxu0 }
 0xd04   : > { %v729_v40 = vpop.f32.mrb[0].mxu1 }
 0xd05   : > { %v803_v46 = vadd.f32 %v802_v41, %v729_v40  ;;  %v1073_v47 = vpop.f32.mrb[1].mxu1 }
 0xd07   : > { %v830_v48 = vmul.f32 %v827_v45, %v803_v46 }
 0xd09   : > { %831 = vst [vmem:[%s1694_s22] sm:$0xf] %v830_v48 }
 0xd0a   : > { %1373 = shalt.err (!%p1370_p8)
}
 0xd0b   : > { %s1374_s22 = scalar_lea.hbm %s1973_s11, 64  ;;  %s1378_s17 = scalar_lea.hbm %s2018_s5, 128 }
 0xd0c   : > { %p1375_p9 = scmp.ne.s32.totalorder %s1973_s11, %s1374_s22  ;;  %p1379_p0 = scmp.lt.u32.totalorder %s1973_s11, %s2018_s5 }
 0xd0d   : > { %p1380_p1 = scmp.lt.u32.totalorder %s1378_s17, %s1374_s22  ;;  %p1382_p3 = scmp.lt.u32.totalorder %s1374_s22, %s1973_s11 }
 0xd0e   : > { %p1376_p12 = pnand %p1375_p9, %p1631_p10 }
 0xd0f   : > { %p1381_p2 = por %p1380_p1, %p1379_p0 }
 0xd10   : > { %p1377_p13 = pneg %p1376_p12 }
 0xd11   : > { %p1383_p4 = por %p1382_p3, %p1381_p2 }
 0xd13   : > { %p1384_p5 = pnand %p1383_p4, %p1377_p13 }
 0xd15   : > { %1387 = shalt.err (!%p1384_p5)
}
 0xd16   : > { %1112 = dma.vmem_to_hbm [thread:$0]  (%p1631_p10), %s881_s15, 64, %s1973_s11, %s1922_s16  }
 0xd17 PF: > { %p1126_p6 = scmp.ge.s32.totalorder %s1488_s25, 2  ;;  %s892_s20 = sand.u32 1, %s1476_s23  }
 0xd18   : > { %s893_s18 = scalar_lea.sflag [#allocation6], %s892_s20 }
 0xd19   : > { %p1117_p7 = pnand %p1126_p6, %p1635_p11 }
 0xd1b   : > { %1467 = dma.done.wait (!%p1117_p7), %s893_s18, 16  }
 0xd1c   : > { %1469 = vsyncadd (!%p1117_p7), %s893_s18, 4294967280  ;;  %s900_s19 = sand.u32 1, %s1034_s27  }
 0xd1d   : > { %s901_s9 = scalar_lea.sflag [#allocation8], %s900_s19 }
 0xd1e   : > { %1471 = dma.done.wait (!%p1117_p7), %s901_s9, 80  }
 0xd1f   : > { %1473 = vsyncadd (!%p1117_p7), %s901_s9, 4294967216  ;;  %p25_p10 = scmp.ge.s32.totalorder %s1616_s28, 4   ;;  %s2031_s23 = smov %s1480_s0 }
 0xd20   : > { %s2032_s0 = smov %s1484_s24  ;;  %s2033_s24 = smov %s1629_s6 }
 0xd21   : > { %s2034_s25 = smov %s1616_s28  ;;  %27 = sbr.rel (!%p25_p10) target bundleno = 20 (0x14), region = 125 }
 0xd28   :  { %914 = vsyncpa [#allocation6], 1 }
 0xd29   :  { %916 = vsyncpa [#allocation6 + $0x1], 1 }
 0xd2a   :  { %917 = vsyncpa [#allocation8], 1 }
 0xd2b   :  { %919 = vsyncpa [#allocation8 + $0x1], 1 }

</bundles_post_ra>
